<compile_context>
chip_gen: v6e
topology: v6e:2x2x1
jax: 0.10.0
libtpu: 0.0.40
codegen_flags: <defaults>
</compile_context>

<pallas_src>
import functools

import jax
import jax.numpy as jnp
from jax.experimental import pallas as pl
from jax.experimental.pallas import tpu as pltpu


def _alpha_loss_kernel(y_value_ref, value_ref, y_policy_ref, policy_ref,
                       out_ref, acc_ref, *, batch, tile_b, tiles_per_split):
    i = pl.program_id(0)   # split axis ("parallel": one per TensorCore on v7x)
    j = pl.program_id(1)   # batch-tile within the split ("arbitrary" reduction)

    @pl.when(j == 0)
    def _init():
        acc_ref[0] = jnp.float32(0.0)   # sum of (value - y_value)^2
        acc_ref[1] = jnp.float32(0.0)   # sum of -policy * log(y_policy)

    # Value contribution: computed exactly once, on the fully-resident
    # zero-padded value vectors (padding contributes 0).
    @pl.when((i == 0) & (j == 0))
    def _value():
        dv = value_ref[...].astype(jnp.float32) - y_value_ref[...].astype(jnp.float32)
        acc_ref[0] = jnp.sum(dv * dv)

    # Policy partial sum over this (tile_b, A) tile.  Rows past the true batch
    # (ragged last tile / clamped overflow tile) are masked BEFORE summation:
    # the OOB region of a partial block is undefined and log() of it may be NaN.
    row0 = (i * tiles_per_split + j) * tile_b
    rows = row0 + jax.lax.broadcasted_iota(jnp.int32, (tile_b, 1), 0)
    valid = rows < batch

    y_pol = jnp.maximum(y_policy_ref[...].astype(jnp.float32), 1e-6)
    pol = policy_ref[...].astype(jnp.float32)
    prod = jnp.where(valid, pol * jnp.log(y_pol), 0.0)
    acc_ref[1] = acc_ref[1] - jnp.sum(prod)

    @pl.when(j == pl.num_programs(1) - 1)
    def _finalize():
        out_ref[0, 0] = acc_ref[0]
        out_ref[0, 1] = acc_ref[1]


def _auto_tile_b(batch, actions, itemsize):
    """Pick tile_b so one policy block is ~2 MiB (2 tensors x 2 buffers ~ 8 MiB,
    comfortably inside the default scoped VMEM on v5e/v6e/v7x)."""
    target_block_bytes = 2 * 1024 * 1024
    tb = target_block_bytes // max(1, actions * itemsize)
    tb = max(8, min(1024, int(tb)))
    tb = (tb // 8) * 8
    tb = min(tb, ((batch + 7) // 8) * 8)   # never bigger than the rounded batch
    return max(8, tb)


def alpha_loss(y_value, value, y_policy, policy, v_const=5, tile_b=None):
    """AlphaLoss forward. value tensors: (B, 1) or (B,); policy tensors: (B, A)."""
    B, A = y_policy.shape
    itemsize = jnp.dtype(y_policy.dtype).itemsize

    if tile_b is None:
        tile_b = _auto_tile_b(B, A, itemsize)
    else:
        tile_b = max(8, (int(tile_b) // 8) * 8)
        tile_b = min(tile_b, ((B + 7) // 8) * 8)

    num_tiles = pl.cdiv(B, tile_b)
    # 2-way "parallel" split so v7x's two TensorCores each stream half the
    # batch; on single-TC chips the outer axis simply runs sequentially.
    num_splits = 2 if num_tiles >= 2 else 1
    tiles_per_split = pl.cdiv(num_tiles, num_splits)
    last_tile = num_tiles - 1

    # Tiny value vectors: zero-pad to a lane-aligned width and keep them fully
    # resident (one block, constant index map).  Padding contributes exactly 0.
    vb_pad = max(128, ((B + 127) // 128) * 128)
    yv = jnp.pad(y_value.reshape(B), (0, vb_pad - B)).reshape(1, vb_pad)
    v = jnp.pad(value.reshape(B), (0, vb_pad - B)).reshape(1, vb_pad)

    def policy_map(i, j):
        t = i * tiles_per_split + j
        return (jnp.minimum(t, last_tile), 0)   # clamp overflow tiles (masked in-kernel)

    kernel = functools.partial(_alpha_loss_kernel,
                               batch=B,
                               tile_b=tile_b,
                               tiles_per_split=tiles_per_split)

    partials = pl.pallas_call(
        kernel,
        out_shape=jax.ShapeDtypeStruct((num_splits, 2), jnp.float32),
        grid_spec=pltpu.PrefetchScalarGridSpec(
            num_scalar_prefetch=0,
            grid=(num_splits, tiles_per_split),
            in_specs=[
                pl.BlockSpec((1, vb_pad), lambda i, j: (0, 0)),   # y_value (resident)
                pl.BlockSpec((1, vb_pad), lambda i, j: (0, 0)),   # value   (resident)
                pl.BlockSpec((tile_b, A), policy_map),            # y_policy
                pl.BlockSpec((tile_b, A), policy_map),            # policy
            ],
            out_specs=pl.BlockSpec((1, 2), lambda i, j: (i, 0),
                                   memory_space=pltpu.MemorySpace.SMEM),
            scratch_shapes=[pltpu.SMEM((2,), jnp.float32)],
        ),
        compiler_params=pltpu.CompilerParams(
            dimension_semantics=("parallel", "arbitrary")),
    )(yv, v, y_policy, policy)   # native dtype in; upcast happens in-kernel

    s_v = jnp.sum(partials[:, 0])
    s_p = jnp.sum(partials[:, 1])
    return (float(v_const) * s_v + s_p) * (1.0 / float(B))


def _reference(y_value, value, y_policy, policy, v_const=5):
    value_error = (value.astype(jnp.float32) - y_value.astype(jnp.float32)) ** 2
    y_policy = jnp.maximum(y_policy.astype(jnp.float32), 1e-6)
    policy_error = jnp.sum(-policy.astype(jnp.float32) * jnp.log(y_policy), axis=1)
    total_error = jnp.squeeze(value_error) * v_const + policy_error
    return jnp.mean(total_error)


if __name__ == "__main__":
    # --- case 1: small, single-tile (B=8, A=128) ---
    B, A = 8, 128
    k1, k2, k3, k4 = jax.random.split(jax.random.PRNGKey(0), 4)
    y_value = jnp.tanh(jax.random.normal(k1, (B, 1), dtype=jnp.float32))
    value = jnp.tanh(jax.random.normal(k2, (B, 1), dtype=jnp.float32))
    y_policy = jax.nn.softmax(jax.random.normal(k3, (B, A), dtype=jnp.float32), axis=1)
    policy = jax.nn.softmax(jax.random.normal(k4, (B, A), dtype=jnp.float32), axis=1)

    loss = jax.block_until_ready(alpha_loss(y_value, value, y_policy, policy, v_const=5))
    ref = _reference(y_value, value, y_policy, policy, v_const=5)
    assert jnp.allclose(loss, ref, rtol=1e-5, atol=1e-5), (loss, ref)

    # --- case 2: ragged batch, multi-tile, 2-way split (B=20, tile_b=8) ---
    B2 = 20
    k5, k6, k7, k8 = jax.random.split(jax.random.PRNGKey(1), 4)
    y_value2 = jnp.tanh(jax.random.normal(k5, (B2, 1), dtype=jnp.float32))
    value2 = jnp.tanh(jax.random.normal(k6, (B2, 1), dtype=jnp.float32))
    y_policy2 = jax.nn.softmax(jax.random.normal(k7, (B2, A), dtype=jnp.float32), axis=1)
    policy2 = jax.nn.softmax(jax.random.normal(k8, (B2, A), dtype=jnp.float32), axis=1)

    loss2 = jax.block_until_ready(
        alpha_loss(y_value2, value2, y_policy2, policy2, v_const=5, tile_b=8))
    ref2 = _reference(y_value2, value2, y_policy2, policy2, v_const=5)
    assert jnp.allclose(loss2, ref2, rtol=1e-5, atol=1e-5), (loss2, ref2)

    # --- case 3: bf16 policy inputs (in-kernel upcast), auto tile_b ---
    B3, A3 = 64, 256
    k9, k10, k11, k12 = jax.random.split(jax.random.PRNGKey(2), 4)
    y_value3 = jnp.tanh(jax.random.normal(k9, (B3, 1), dtype=jnp.float32))
    value3 = jnp.tanh(jax.random.normal(k10, (B3, 1), dtype=jnp.float32))
    y_policy3 = jax.nn.softmax(
        jax.random.normal(k11, (B3, A3), dtype=jnp.float32), axis=1).astype(jnp.bfloat16)
    policy3 = jax.nn.softmax(
        jax.random.normal(k12, (B3, A3), dtype=jnp.float32), axis=1).astype(jnp.bfloat16)

    loss3 = jax.block_until_ready(alpha_loss(y_value3, value3, y_policy3, policy3, v_const=5))
    ref3 = _reference(y_value3, value3, y_policy3, policy3, v_const=5)
    assert jnp.allclose(loss3, ref3, rtol=1e-4, atol=1e-4), (loss3, ref3)

    print("KERNEL_OK")
</pallas_src>

<mosaic_0001>
module attributes {stable_mosaic.version = 11 : i64} {
  func.func @_alpha_loss_kernel(%arg0: i32, %arg1: i32, %arg2: memref<1x128xf32, #tpu.memory_space<vmem>>, %arg3: memref<1x128xf32, #tpu.memory_space<vmem>>, %arg4: memref<8x128xf32, #tpu.memory_space<vmem>>, %arg5: memref<8x128xf32, #tpu.memory_space<vmem>>, %arg6: memref<1x2xf32, #tpu.memory_space<smem>>, %arg7: memref<2xf32, #tpu.memory_space<smem>>) attributes {dimension_semantics = [#tpu.dimension_semantics<parallel>, #tpu.dimension_semantics<arbitrary>], iteration_bounds = array<i64: 1, 1>, scalar_prefetch = 0 : i64, scratch_operands = 1 : i64, tpu.core_type = #tpu.core_type<tc>, window_params = [{pipeline_mode = #tpu.pipeline_mode<synchronous>, transform_indices = @transform_0, window_bounds = array<i64: 1, 128>}, {pipeline_mode = #tpu.pipeline_mode<synchronous>, transform_indices = @transform_1, window_bounds = array<i64: 1, 128>}, {transform_indices = @transform_2, window_bounds = array<i64: 8, 128>}, {transform_indices = @transform_3, window_bounds = array<i64: 8, 128>}, {transform_indices = @transform_4, window_bounds = array<i64: 1, 2>}]} {
    %c0_i32 = arith.constant 0 : i32
    %0 = arith.cmpi eq, %arg1, %c0_i32 : i32
    %1 = arith.extui %0 : i1 to i32
    %c0_i32_0 = arith.constant 0 : i32
    %2 = arith.cmpi ne, %1, %c0_i32_0 : i32
    scf.if %2 {
      %cst_13 = arith.constant 0.000000e+00 : f32
      %c0_14 = arith.constant 0 : index
      %36 = memref.load %arg7[%c0_14] : memref<2xf32, #tpu.memory_space<smem>>
      memref.store %cst_13, %arg7[%c0_14] : memref<2xf32, #tpu.memory_space<smem>>
      %cst_15 = arith.constant 0.000000e+00 : f32
      %c1_16 = arith.constant 1 : index
      %37 = memref.load %arg7[%c1_16] : memref<2xf32, #tpu.memory_space<smem>>
      memref.store %cst_15, %arg7[%c1_16] : memref<2xf32, #tpu.memory_space<smem>>
    } else {
    }
    %c0_i32_1 = arith.constant 0 : i32
    %3 = arith.cmpi eq, %arg0, %c0_i32_1 : i32
    %c0_i32_2 = arith.constant 0 : i32
    %4 = arith.cmpi eq, %arg1, %c0_i32_2 : i32
    %5 = arith.andi %3, %4 : i1
    %6 = arith.extui %5 : i1 to i32
    %c0_i32_3 = arith.constant 0 : i32
    %7 = arith.cmpi ne, %6, %c0_i32_3 : i32
    scf.if %7 {
      %c0_13 = arith.constant 0 : index
      %c0_14 = arith.constant 0 : index
      %36 = vector.load %arg3[%c0_13, %c0_14] : memref<1x128xf32, #tpu.memory_space<vmem>>, vector<1x128xf32>
      %c0_15 = arith.constant 0 : index
      %c0_16 = arith.constant 0 : index
      %37 = vector.load %arg2[%c0_15, %c0_16] : memref<1x128xf32, #tpu.memory_space<vmem>>, vector<1x128xf32>
      %38 = arith.subf %36, %37 : vector<1x128xf32>
      %39 = arith.mulf %38, %38 : vector<1x128xf32>
      %40 = vector.shape_cast %39 : vector<1x128xf32> to vector<1x1x128xf32>
      %cst_17 = arith.constant dense<0.000000e+00> : vector<1xf32>
      %41 = vector.multi_reduction <add>, %40, %cst_17 [1, 2] : vector<1x1x128xf32> to vector<1xf32>
      %42 = vector.shape_cast %41 : vector<1xf32> to vector<1x1x1xf32>
      %43 = vector.extract %42[0, 0, 0] : f32 from vector<1x1x1xf32>
      %c0_18 = arith.constant 0 : index
      %44 = memref.load %arg7[%c0_18] : memref<2xf32, #tpu.memory_space<smem>>
      memref.store %43, %arg7[%c0_18] : memref<2xf32, #tpu.memory_space<smem>>
    } else {
    }
    %c1_i32 = arith.constant 1 : i32
    %8 = arith.muli %arg0, %c1_i32 : i32
    %9 = arith.addi %8, %arg1 : i32
    %c8_i32 = arith.constant 8 : i32
    %10 = arith.muli %9, %c8_i32 : i32
    %11 = tpu.iota {dimensions = array<i32: 0>} : vector<8x1xi32>
    %12 = vector.broadcast %10 : i32 to vector<8x1xi32>
    %13 = arith.addi %12, %11 : vector<8x1xi32>
    %c8_i32_4 = arith.constant 8 : i32
    %14 = vector.broadcast %c8_i32_4 : i32 to vector<8x1xi32>
    %15 = arith.cmpi slt, %13, %14 : vector<8x1xi32>
    %c0 = arith.constant 0 : index
    %c0_5 = arith.constant 0 : index
    %16 = vector.load %arg4[%c0, %c0_5] : memref<8x128xf32, #tpu.memory_space<vmem>>, vector<8x128xf32>
    %cst = arith.constant 9.99999997E-7 : f32
    %17 = vector.broadcast %cst : f32 to vector<8x128xf32>
    %18 = arith.maximumf %16, %17 : vector<8x128xf32>
    %c0_6 = arith.constant 0 : index
    %c0_7 = arith.constant 0 : index
    %19 = vector.load %arg5[%c0_6, %c0_7] : memref<8x128xf32, #tpu.memory_space<vmem>>, vector<8x128xf32>
    %20 = math.log %18 : vector<8x128xf32>
    %21 = arith.mulf %19, %20 : vector<8x128xf32>
    %cst_8 = arith.constant 0.000000e+00 : f32
    %22 = vector.shape_cast %15 : vector<8x1xi1> to vector<8x1xi1>
    %23 = vector.broadcast %22 : vector<8x1xi1> to vector<8x128xi1>
    %24 = vector.broadcast %cst_8 : f32 to vector<8x128xf32>
    %25 = arith.select %23, %21, %24 : vector<8x128xi1>, vector<8x128xf32>
    %c1 = arith.constant 1 : index
    %26 = memref.load %arg7[%c1] : memref<2xf32, #tpu.memory_space<smem>>
    %27 = vector.shape_cast %25 : vector<8x128xf32> to vector<1x8x128xf32>
    %cst_9 = arith.constant dense<0.000000e+00> : vector<1xf32>
    %28 = vector.multi_reduction <add>, %27, %cst_9 [1, 2] : vector<1x8x128xf32> to vector<1xf32>
    %29 = vector.shape_cast %28 : vector<1xf32> to vector<1x1x1xf32>
    %30 = vector.extract %29[0, 0, 0] : f32 from vector<1x1x1xf32>
    %31 = arith.subf %26, %30 : f32
    %c1_10 = arith.constant 1 : index
    %32 = memref.load %arg7[%c1_10] : memref<2xf32, #tpu.memory_space<smem>>
    memref.store %31, %arg7[%c1_10] : memref<2xf32, #tpu.memory_space<smem>>
    %c0_i32_11 = arith.constant 0 : i32
    %33 = arith.cmpi eq, %arg1, %c0_i32_11 : i32
    %34 = arith.extui %33 : i1 to i32
    %c0_i32_12 = arith.constant 0 : i32
    %35 = arith.cmpi ne, %34, %c0_i32_12 : i32
    scf.if %35 {
      %c0_13 = arith.constant 0 : index
      %36 = memref.load %arg7[%c0_13] : memref<2xf32, #tpu.memory_space<smem>>
      %c0_14 = arith.constant 0 : index
      %c0_15 = arith.constant 0 : index
      %37 = memref.load %arg6[%c0_14, %c0_15] : memref<1x2xf32, #tpu.memory_space<smem>>
      memref.store %36, %arg6[%c0_14, %c0_15] : memref<1x2xf32, #tpu.memory_space<smem>>
      %c1_16 = arith.constant 1 : index
      %38 = memref.load %arg7[%c1_16] : memref<2xf32, #tpu.memory_space<smem>>
      %c0_17 = arith.constant 0 : index
      %c1_18 = arith.constant 1 : index
      %39 = memref.load %arg6[%c0_17, %c1_18] : memref<1x2xf32, #tpu.memory_space<smem>>
      memref.store %38, %arg6[%c0_17, %c1_18] : memref<1x2xf32, #tpu.memory_space<smem>>
    } else {
    }
    return
  }
  func.func @transform_0(%arg0: i32, %arg1: i32) -> (i32, i32) {
    %c0_i32 = arith.constant 0 : i32
    %c0_i32_0 = arith.constant 0 : i32
    %c0_i32_1 = arith.constant 0 : i32
    return %c0_i32, %c0_i32_0 : i32, i32
  }
  func.func @transform_1(%arg0: i32, %arg1: i32) -> (i32, i32) {
    %c0_i32 = arith.constant 0 : i32
    %c0_i32_0 = arith.constant 0 : i32
    %c0_i32_1 = arith.constant 0 : i32
    return %c0_i32, %c0_i32_0 : i32, i32
  }
  func.func @transform_2(%arg0: i32, %arg1: i32) -> (i32, i32) {
    %c1_i32 = arith.constant 1 : i32
    %0 = arith.muli %arg0, %c1_i32 : i32
    %1 = arith.addi %0, %arg1 : i32
    %c0_i32 = arith.constant 0 : i32
    %2 = arith.minsi %1, %c0_i32 : i32
    %c0_i32_0 = arith.constant 0 : i32
    %c0_i32_1 = arith.constant 0 : i32
    return %2, %c0_i32_0 : i32, i32
  }
  func.func @transform_3(%arg0: i32, %arg1: i32) -> (i32, i32) {
    %c1_i32 = arith.constant 1 : i32
    %0 = arith.muli %arg0, %c1_i32 : i32
    %1 = arith.addi %0, %arg1 : i32
    %c0_i32 = arith.constant 0 : i32
    %2 = arith.minsi %1, %c0_i32 : i32
    %c0_i32_0 = arith.constant 0 : i32
    %c0_i32_1 = arith.constant 0 : i32
    return %2, %c0_i32_0 : i32, i32
  }
  func.func @transform_4(%arg0: i32, %arg1: i32) -> (i32, i32) {
    %c0_i32 = arith.constant 0 : i32
    %c0_i32_0 = arith.constant 0 : i32
    return %arg0, %c0_i32 : i32, i32
  }
}

</mosaic_0001>

<bundles_post_ra>
// kernel: tpu_custom_call.1
= control target key start
LH: loop header
LB: loop body
LE: loop exit
PB: predicated region body
PF: predicated region fallthrough
CT: control target
= control target key end

     0   :  { %9 = vsyncpa [#allocation4], 0  ;;  %s286_s0 = inlined_call_operand.hbm [shape: f32[1,128], index: 0, kind: input, shape index: {}]   ;;  %s287_s1 = inlined_call_operand.vmem [shape: f32[1,128], index: 1, kind: input, shape index: {}]   ;;  %s288_s2 = inlined_call_operand.hbm [shape: f32[8,128], index: 2, kind: input, shape index: {}]   ;;  %s289_s3 = inlined_call_operand.hbm [shape: f32[8,128], index: 3, kind: input, shape index: {}]   ;;  %s290_s4 = inlined_call_operand.hbm [shape: f32[1,2], index: 4, kind: output, shape index: {}]  }
   0x1   :  { %10 = vsyncpa [#allocation7], 0 }
   0x2   :  { %11 = vsyncpa [#allocation5], 0  ;;  %s242_s15 = smov [#allocation6]   ;;  %s243_s17 = smov [#allocation3]  }
   0x3   :  { %s35_s16 = sshll.u32 %s242_s15, 4  ;;  %s18_s18 = sshll.u32 %s243_s17, 4  ;;  %s36_s16 = int_to_ptr.vmem [resolvable:$true] %s35_s16  ;;  %s19_s18 = int_to_ptr.vmem [resolvable:$true] %s18_s18 }
   0x4   :  { %s176_s19 = scalar_lea.vmem %s36_s16, 128  ;;  %p181_p1 = scmp.lt.s32.totalorder %s36_s16, %s36_s16 }
   0x5   :  { %p177_p0 = scmp.ne.s32.totalorder %s36_s16, %s176_s19  ;;  %p182_p2 = scmp.lt.s32.totalorder %s176_s19, %s176_s19 }
   0x7   :  { %p183_p3 = por %p182_p2, %p181_p1 }
   0x9   :  { %p184_p4 = pnand %p183_p3, %p177_p0 }
   0xb   :  { %187 = shalt.err (!%p184_p4)
}
   0xc   :  { %38 = dma.hbm_to_vmem [thread:$0]  %s288_s2, 128, %s36_s16, [#allocation7]  }
   0xd   :  { %s196_s22 = scalar_lea.vmem %s19_s18, 16  ;;  %s200_s23 = scalar_lea.vmem %s19_s18, 32 }
   0xe   :  { %p197_p5 = scmp.ne.s32.totalorder %s19_s18, %s196_s22  ;;  %p201_p6 = scmp.lt.s32.totalorder %s19_s18, %s19_s18 }
   0xf   :  { %p202_p7 = scmp.lt.s32.totalorder %s200_s23, %s196_s22 }
  0x11   :  { %p203_p8 = por %p202_p7, %p201_p6 }
  0x13   :  { %p204_p9 = pnand %p203_p8, %p197_p5 }
  0x15   :  { %207 = shalt.err (!%p204_p9)
}
  0x16   :  { %21 = dma.hbm_to_vmem [thread:$0]  %s286_s0, 16, %s19_s18, [#allocation4]  }
  0x17   :  { %s244_s26 = smov [#allocation8]  }
  0x18   :  { %s50_s27 = sshll.u32 %s244_s26, 4  ;;  %s51_s27 = int_to_ptr.vmem [resolvable:$true] %s50_s27 }
  0x19   :  { %s216_s28 = scalar_lea.vmem %s51_s27, 128  ;;  %p221_p11 = scmp.lt.s32.totalorder %s51_s27, %s51_s27 }
  0x1a   :  { %p217_p10 = scmp.ne.s32.totalorder %s51_s27, %s216_s28  ;;  %p222_p12 = scmp.lt.s32.totalorder %s216_s28, %s216_s28 }
  0x1c   :  { %p223_p13 = por %p222_p12, %p221_p11 }
  0x1e   :  { %p224_p0 = pnand %p223_p13, %p217_p10 }
  0x20   :  { %227 = shalt.err (!%p224_p0)
}
  0x21   :  { %53 = dma.hbm_to_vmem [thread:$0]  %s289_s3, 128, %s51_s27, [#allocation7]  }
  0x22   :  { %236 = dma.done.wait [#allocation4], 16  }
  0x23   :  { %237 = vsyncadd [#allocation4], 4294967280 }
  0x24   :  { %238 = dma.done.wait [#allocation7], 256  }
  0x25   :  { %239 = vsyncadd [#allocation7], 4294967040  ;;  %v82_v0 = vld [vmem:[%s287_s1] sm:$0x1]  ;;  %v106_v2 = vld [vmem:[#allocation6] sm:$0xff]  ;;  %vm86_vm0 = vcmask 1040384  }
  0x26   :  { %v83_v1 = vld [vmem:[#allocation3] sm:$0x1]  ;;  %v107_v4 = vmax.f32 %v106_v2, 1e-06  ;;  %v108_v8 = vld [vmem:[#allocation8] sm:$0xff]  ;;  %s245_s6 = smov [#allocation9]  }
  0x27   :  { %v84_v3 = vsub.f32 %v82_v0, %v83_v1 }
  0x28   :  { %166 = vlog2.f32 %v107_v4 }
  0x29   :  { %v85_v5 = vmul.f32 %v84_v3, %v84_v3 }
  0x2b   :  { %v87_v6 = vsel %vm86_vm0, %v85_v5, 0.0 }
  0x2c   :  { %88 = vadd.xlane.f32.xlu0 %v87_v6 }
  0x35   :  { %v167_v7 = vpop.eup %166 }
  0x36   :  { %v110_v9 = vmul.f32 0.6931472, %v167_v7 }
  0x38   :  { %v111_v10 = vmul.f32 %v110_v9, %v108_v8 }
  0x3a   :  { %116 = vadd.xlane.f32.xlu0 %v111_v10 }
  0xb5   :  { %v89_v11 = vpop.xlane.xlu0 %88 }
  0xb6   :  { %v90_v12 = vrot.slane %v89_v11, 4 }
  0xb8   :  { %v91_v13 = vadd.f32 %v90_v12, %v89_v11 }
  0xba   :  { %v92_v14 = vrot.slane %v91_v13, 2 }
  0xbc   :  { %v93_v15 = vadd.f32 %v92_v14, %v91_v13 }
  0xbe   :  { %v94_v16 = vrot.slane %v93_v15, 1 }
  0xc0   :  { %v95_v17 = vadd.f32 %v94_v16, %v93_v15 }
  0xc2   :  { %158 = vpush %v95_v17 }
  0xc3   :  { %v117_v18 = vpop.xlane.xlu0 %116 }
  0xc4   :  { %v118_v19 = vrot.slane %v117_v18, 4 }
  0xc6   :  { %v119_v20 = vadd.f32 %v118_v19, %v117_v18 }
  0xc8   :  { %v120_v21 = vrot.slane %v119_v20, 2 }
  0xca   :  { %v121_v22 = vadd.f32 %v120_v21, %v119_v20 }
  0xcc   :  { %v122_v23 = vrot.slane %v121_v22, 1 }
  0xce   :  { %v123_v24 = vadd.f32 %v122_v23, %v121_v22 }
  0xd0   :  { %160 = vpush %v123_v24 }
  0xf3   :  { %s159_s1 = spop %158 }
  0xf4   :  { %133 = sst [smem:[#allocation9]] %s159_s1 }
 0x101   :  { %s161_s3 = spop %160 }
 0x102   :  { %s125_s5 = ssub.f32 0.0, %s161_s3 }
 0x104   :  { %136 = sst [smem:[#allocation9 + $0x1]] %s125_s5 }
 0x105   :  { %144 = dma.smem_to_hbm %s245_s6, 16, %s290_s4, [#allocation5]  }
 0x106   :  { %240 = dma.done.wait [#allocation5], 16  }
 0x107   :  { %241 = vsyncadd [#allocation5], 4294967280 }
 0x108   :  { %148 = sfence }
 0x109   :  { %149 = vsyncpa [#allocation4], 1 }
 0x10a   :  { %150 = vsyncpa [#allocation7], 1 }
 0x10b   :  { %151 = vsyncpa [#allocation5], 1 }

</bundles_post_ra>
